<compile_context>
chip_gen: v7x
topology: tpu7x:2x2x1
jax: 0.10.0
libtpu: 0.0.40
codegen_flags: <defaults>
</compile_context>

<pallas_src>
import functools

import jax
import jax.numpy as jnp
import numpy as np
from jax.experimental import pallas as pl
from jax.experimental.pallas import tpu as pltpu


def _pos_embed_kernel(freq_ref, phase_ref, o_ref):
    # freq_ref/phase_ref: (1, B*D) f32 tables (inv_freq tiled over B, phase is
    # 0 for even features, pi/2 for odd features so sin() also covers cos()).
    # o_ref: (TL, B*D) lane-dense output tile.
    TL, _ = o_ref.shape
    i = pl.program_id(0)

    # Global position index for this tile, shape (TL, 1).
    local = jax.lax.broadcasted_iota(jnp.int32, (TL, 1), 0)
    pos_i = local + i * TL
    pos = pos_i.astype(jnp.float32)

    # Single transcendental per (pos, lane) element.
    angle = pos * freq_ref[...] + phase_ref[...]          # (TL, B*D)
    val = jnp.sin(angle)

    # Reference leaves the pos == 0 row as all zeros (never passed to sin/cos).
    val = jnp.where(pos_i == 0, jnp.float32(0.0), val)

    o_ref[...] = val.astype(o_ref.dtype)


def _pick_tile_rows(L, lanes_padded, target_bytes=8 * 1024 * 1024):
    """Rows of L per output tile, sized against the *padded* VMEM footprint
    (lane dim padded to a multiple of 128, f32).  A double-buffered 8 MiB
    tile stays comfortably inside a 32 MiB scoped VMEM budget everywhere."""
    row_bytes = lanes_padded * 4  # f32
    rows = max(8, (target_bytes // max(1, row_bytes)) // 8 * 8)
    if rows >= L:
        # Whole output fits in one tile.  If it can be split into two even,
        # 8-aligned tiles, do so -> both v7x TensorCores get work.
        if L >= 16 and L % 16 == 0:
            return L // 2
        return L  # block dim == full array dim satisfies the (8,128) rule
    return rows   # multiple of 8; ragged last tile is masked by Pallas


def position_embedding_sine(x, temperature=10000):
    """JAX/Pallas equivalent of PositionEmbeddingSine.forward.

    x: array of shape (position_length, bs, d_model) -- only its shape is
    used (values are never read), matching the reference module.
    Returns float32 array of shape (position_length, bs, d_model).
    """
    L, bs, d_model = x.shape
    BD = bs * d_model

    # Host-side float64 tables (matches reference's float64 pow), tiled over
    # the batch so the kernel works on a lane-dense (1, B*D) layout.
    j = np.arange(d_model)
    inv_freq64 = 1.0 / np.power(float(temperature), 2.0 * (j // 2) / d_model)
    phase64 = (j % 2).astype(np.float64) * (np.pi / 2.0)
    inv_freq = jnp.asarray(np.tile(inv_freq64, bs)[None, :], dtype=jnp.float32)
    phase = jnp.asarray(np.tile(phase64, bs)[None, :], dtype=jnp.float32)

    lanes_padded = ((BD + 127) // 128) * 128
    tl = _pick_tile_rows(L, lanes_padded)
    num_tiles = pl.cdiv(L, tl)

    out2d = pl.pallas_call(
        _pos_embed_kernel,
        out_shape=jax.ShapeDtypeStruct((L, BD), jnp.float32),
        grid=(num_tiles,),
        in_specs=[
            pl.BlockSpec((1, BD), lambda i: (0, 0)),   # inv_freq (constant block)
            pl.BlockSpec((1, BD), lambda i: (0, 0)),   # phase    (constant block)
        ],
        out_specs=pl.BlockSpec((tl, BD), lambda i: (i, 0)),
        compiler_params=pltpu.CompilerParams(
            dimension_semantics=("parallel",),
            vmem_limit_bytes=32 * 1024 * 1024,  # raise v5e's 16 MiB default; safe on all gens
        ),
        cost_estimate=pl.CostEstimate(
            flops=2 * L * BD,
            transcendentals=L * BD,
            bytes_accessed=L * BD * 4 + 2 * BD * 4,
        ),
    )(inv_freq, phase)

    # Free reshape back to the PyTorch return layout (L, bs, d_model).
    return out2d.reshape(L, bs, d_model)


def _reference_numpy(x, temperature=10000):
    """Direct transcription of the PyTorch/NumPy reference."""
    L, bs, d_model = x.shape
    position = np.array(
        [
            [pos / temperature ** (2 * (j // 2) / d_model) for j in range(d_model)]
            if pos != 0
            else np.zeros(d_model)
            for pos in range(L)
        ]
    )
    position[1:, 0::2] = np.sin(position[1:, 0::2])
    position[1:, 1::2] = np.cos(position[1:, 1::2])
    position = position.astype(np.float32)
    position = np.tile(position[None], (bs, 1, 1))          # repeat(bs, 1, 1)
    return np.transpose(position, (1, 0, 2))                # transpose(0, 1)


if __name__ == "__main__":
    key = jax.random.PRNGKey(0)
    L, bs, d_model = 8, 2, 32
    x = jax.random.normal(key, (L, bs, d_model), dtype=jnp.float32)

    out = position_embedding_sine(x, temperature=10000)
    out = jax.block_until_ready(out)

    ref = _reference_numpy(np.asarray(x), temperature=10000)
    assert out.shape == (L, bs, d_model), out.shape
    assert out.dtype == jnp.float32, out.dtype
    np.testing.assert_allclose(np.asarray(out), ref, rtol=1e-5, atol=1e-5)

    print("KERNEL_OK")
</pallas_src>

<mosaic_0001>
module attributes {stable_mosaic.version = 11 : i64} {
  func.func @_pos_embed_kernel(%arg0: i32, %arg1: memref<1x64xf32, #tpu.memory_space<vmem>>, %arg2: memref<1x64xf32, #tpu.memory_space<vmem>>, %arg3: memref<8x64xf32, #tpu.memory_space<vmem>>) attributes {dimension_semantics = [#tpu.dimension_semantics<parallel>], iteration_bounds = array<i64: 1>, scalar_prefetch = 0 : i64, scratch_operands = 0 : i64, tpu.core_type = #tpu.core_type<tc>, window_params = [{pipeline_mode = #tpu.pipeline_mode<synchronous>, transform_indices = @transform_0, window_bounds = array<i64: 1, 64>}, {pipeline_mode = #tpu.pipeline_mode<synchronous>, transform_indices = @transform_1, window_bounds = array<i64: 1, 64>}, {transform_indices = @transform_2, window_bounds = array<i64: 8, 64>}]} {
    %0 = tpu.iota {dimensions = array<i32: 0>} : vector<8x1xi32>
    %c8_i32 = arith.constant 8 : i32
    %1 = arith.muli %arg0, %c8_i32 : i32
    %2 = vector.broadcast %1 : i32 to vector<8x1xi32>
    %3 = arith.addi %0, %2 : vector<8x1xi32>
    %4 = arith.sitofp %3 : vector<8x1xi32> to vector<8x1xf32>
    %c0 = arith.constant 0 : index
    %c0_0 = arith.constant 0 : index
    %5 = vector.load %arg1[%c0, %c0_0] : memref<1x64xf32, #tpu.memory_space<vmem>>, vector<1x64xf32>
    %6 = vector.broadcast %4 : vector<8x1xf32> to vector<8x64xf32>
    %7 = vector.broadcast %5 : vector<1x64xf32> to vector<8x64xf32>
    %8 = arith.mulf %6, %7 : vector<8x64xf32>
    %c0_1 = arith.constant 0 : index
    %c0_2 = arith.constant 0 : index
    %9 = vector.load %arg2[%c0_1, %c0_2] : memref<1x64xf32, #tpu.memory_space<vmem>>, vector<1x64xf32>
    %10 = vector.broadcast %9 : vector<1x64xf32> to vector<8x64xf32>
    %11 = arith.addf %8, %10 : vector<8x64xf32>
    %12 = math.sin %11 : vector<8x64xf32>
    %c0_i32 = arith.constant 0 : i32
    %13 = vector.broadcast %c0_i32 : i32 to vector<8x1xi32>
    %14 = arith.cmpi eq, %3, %13 : vector<8x1xi32>
    %cst = arith.constant 0.000000e+00 : f32
    %15 = vector.shape_cast %14 : vector<8x1xi1> to vector<8x1xi1>
    %16 = vector.broadcast %15 : vector<8x1xi1> to vector<8x64xi1>
    %17 = vector.broadcast %cst : f32 to vector<8x64xf32>
    %18 = arith.select %16, %17, %12 : vector<8x64xi1>, vector<8x64xf32>
    %c0_3 = arith.constant 0 : index
    %c0_4 = arith.constant 0 : index
    %19 = vector.load %arg3[%c0_3, %c0_4] : memref<8x64xf32, #tpu.memory_space<vmem>>, vector<8x64xf32>
    tpu.vector_store %arg3[%c0_3, %c0_4], %18 {strides = array<i32>} : memref<8x64xf32, #tpu.memory_space<vmem>>, vector<8x64xf32>,
    return
  }
  func.func @transform_0(%arg0: i32) -> (i32, i32) {
    %c0_i32 = arith.constant 0 : i32
    %c0_i32_0 = arith.constant 0 : i32
    %c0_i32_1 = arith.constant 0 : i32
    return %c0_i32, %c0_i32_0 : i32, i32
  }
  func.func @transform_1(%arg0: i32) -> (i32, i32) {
    %c0_i32 = arith.constant 0 : i32
    %c0_i32_0 = arith.constant 0 : i32
    %c0_i32_1 = arith.constant 0 : i32
    return %c0_i32, %c0_i32_0 : i32, i32
  }
  func.func @transform_2(%arg0: i32) -> (i32, i32) {
    %c0_i32 = arith.constant 0 : i32
    %c0_i32_0 = arith.constant 0 : i32
    return %arg0, %c0_i32 : i32, i32
  }
}

</mosaic_0001>

<bundles_post_ra>
// kernel: tpu_custom_call.1
= control target key start
LH: loop header
LB: loop body
LE: loop exit
PB: predicated region body
PF: predicated region fallthrough
CT: control target
= control target key end

     0   :  { %7 = vsyncpa [#allocation3], 0  ;;  %s316_s0 = inlined_call_operand.hbm [shape: f32[1,64], index: 0, kind: input, shape index: {}]   ;;  %s317_s1 = inlined_call_operand.vmem [shape: f32[1,64], index: 1, kind: input, shape index: {}]   ;;  %s318_s2 = inlined_call_operand.hbm [shape: f32[8,64], index: 2, kind: output, shape index: {}]  }
   0x1   :  { %8 = vsyncpa [#allocation4], 0  ;;  %s241_s9 = smov [#allocation2]   ;;  %s193_s13 = scalar_lea.hbm %s316_s0, 16 }
   0x2   :  { %s15_s10 = sshll.u32 %s241_s9, 4  ;;  %p194_p0 = scmp.ne.s32.totalorder %s316_s0, %s193_s13  ;;  %s16_s10 = int_to_ptr.vmem [resolvable:$true] %s15_s10 }
   0x3   :  { %p197_p1 = scmp.lt.u32.totalorder %s193_s13, %s316_s0 }
   0x5   :  { %p199_p2 = pnand %p197_p1, %p194_p0 }
   0x7   :  { %202 = shalt.err (!%p199_p2)
}
   0x8   :  { %s203_s18 = scalar_lea.vmem %s16_s10, 16  ;;  %s207_s19 = scalar_lea.vmem %s16_s10, 32 }
   0x9   :  { %p204_p3 = scmp.ne.s32.totalorder %s16_s10, %s203_s18  ;;  %p208_p4 = scmp.lt.s32.totalorder %s16_s10, %s16_s10 }
   0xa   :  { %p209_p5 = scmp.lt.s32.totalorder %s207_s19, %s203_s18 }
   0xc   :  { %p210_p6 = por %p209_p5, %p208_p4 }
   0xe   :  { %p211_p7 = pnand %p210_p6, %p204_p3 }
  0x10   :  { %214 = shalt.err (!%p211_p7)
}
  0x11   :  { %18 = dma.hbm_to_vmem [thread:$0]  %s316_s0, 16, %s16_s10, [#allocation3]  }
  0x12   :  { %237 = dma.done.wait [#allocation3], 16  }
  0x13   :  { %238 = vsyncadd [#allocation3], 4294967280  ;;  %v24_v0 = vlaneseq  ;;  %v171_v3 = vld [vmem:[#allocation2] ss:$0 sm:$0xff]  ;;  %v242_v18 = vmov 683565275  }
  0x14   :  { %v172_v4 = vld [vmem:[%s317_s1] ss:$0 sm:$0xff]  ;;  %v243_v20 = vmov 2475754826   ;;  %v244_v22 = vmov 2131351028  }
  0x15   :  { %v276_v1 = vshrl.u32 %v24_v0, 7  ;;  %v245_v24 = vmov 2102212464   ;;  %v246_v26 = vmov 920167782   ;;  %s248_s0 = smov [#allocation5]  }
  0x16   :  { %v247_v33 = vmov 1326507024   ;;  %s162_s1 = sshll.u32 %s248_s0, 4  ;;  %vm154_vm14 = vcmask 523264   ;;  %s163_s1 = int_to_ptr.vmem [resolvable:$true] %s162_s1 }
  0x17   :  { %v29_v2 = vcvt.s32.f32 %v276_v1  ;;  %vm150_vm13 = vcmp.eq.s32.totalorder %v276_v1, 0  ;;  %s215_s24 = scalar_lea.vmem %s163_s1, 128  ;;  %p220_p9 = scmp.lt.s32.totalorder %s163_s1, %s163_s1 }
  0x18   :  { %p216_p8 = scmp.ne.s32.totalorder %s163_s1, %s215_s24  ;;  %p221_p10 = scmp.lt.s32.totalorder %s215_s24, %s215_s24 }
  0x19   :  { %v37_v5 = vmul.f32 %v171_v3, %v29_v2 }
  0x1a   :  { %p222_p11 = por %p221_p10, %p220_p9 }
  0x1b   :  { %v282_v6 = vadd.f32 %v172_v4, %v37_v5 }
  0x1c   :  { %p223_p12 = pnand %p222_p11, %p216_p8 }
  0x1d   :  { %v49_v7 = vand.u32 2139095040, %v282_v6  ;;  %v46_v9 = vand.u32 2147483647, %v282_v6  ;;  %vm48_vm7 = vcmp.lt.s32.totalorder %v282_v6, 0  ;;  %vm138_vm12 = vweird.f32 %v282_v6 }
  0x1f   :  { %v50_v8 = vshrl.u32 %v49_v7, 23  ;;  %v53_v12 = vand.u32 8388607, %v46_v9  ;;  %vm47_vm8 = vcmp.le.f32.partialorder %v46_v9, 0.7853982 }
  0x21   :  { %v173_v10 = vadd.s32 4294967169, %v50_v8  ;;  %v54_v15 = vor.u32 8388608, %v53_v12 }
  0x23   :  { %v56_v11 = vadd.s32 1, %v173_v10  ;;  %v94_v35 = vshll.u32 %v54_v15, 8 }
  0x25   :  { %vm57_vm0 = vcmp.gt.s32.totalorder %v56_v11, 0 }
  0x26   :  { %v58_v13 = vsel %vm57_vm0, %v56_v11, 0 }
  0x27   :  { %v60_v14 = vand.u32 31, %v58_v13  ;;  %v59_v16 = vshrl.u32 %v58_v13, 5 }
  0x29   :  { %v61_v17 = vsub.s32 32, %v60_v14  ;;  %v63_v19 = vshll.u32 %v242_v18, %v60_v14  ;;  %v66_v21 = vshll.u32 %v243_v20, %v60_v14  ;;  %v69_v23 = vshll.u32 %v244_v22, %v60_v14 }
  0x2a   :  { %v72_v25 = vshll.u32 %v245_v24, %v60_v14  ;;  %v75_v27 = vshll.u32 %v246_v26, %v60_v14  ;;  %vm78_vm1 = vcmp.lt.s32.totalorder %v59_v16, 1  ;;  %vm81_vm2 = vcmp.lt.s32.totalorder %v59_v16, 4 }
  0x2b   :  { %v62_v28 = vshrl.u32 %v242_v18, %v61_v17  ;;  %v64_v29 = vshrl.u32 %v243_v20, %v61_v17  ;;  %v67_v30 = vshrl.u32 %v244_v22, %v61_v17  ;;  %v70_v31 = vshrl.u32 %v245_v24, %v61_v17 }
  0x2c   :  { %v73_v32 = vshrl.u32 %v246_v26, %v61_v17  ;;  %v76_v34 = vshrl.u32 %v247_v33, %v61_v17  ;;  %vm79_vm3 = vcmp.lt.s32.totalorder %v59_v16, 2  ;;  %vm80_vm4 = vcmp.lt.s32.totalorder %v59_v16, 3 }
  0x2d   :  { %v65_v36 = vor.u32 %v64_v29, %v63_v19  ;;  %v68_v37 = vor.u32 %v67_v30, %v66_v21  ;;  %v71_v38 = vor.u32 %v70_v31, %v69_v23 }
  0x2e   :  { %v74_v39 = vor.u32 %v73_v32, %v72_v25  ;;  %v77_v40 = vor.u32 %v76_v34, %v75_v27 }
  0x2f   :  { %v82_v41 = vsel %vm78_vm1, %v62_v28, %v65_v36  ;;  %v83_v42 = vsel %vm81_vm2, %v71_v38, 2102212464  ;;  %v86_v43 = vsel %vm78_vm1, %v65_v36, %v68_v37  ;;  %v90_v44 = vsel %vm78_vm1, %v68_v37, %v71_v38 }
  0x30   :  { %v84_v45 = vsel %vm80_vm4, %v68_v37, %v83_v42  ;;  %v87_v46 = vsel %vm81_vm2, %v74_v39, 920167782  ;;  %v91_v47 = vsel %vm81_vm2, %v77_v40, 1326507024 }
  0x31   :  { %v88_v48 = vsel %vm80_vm4, %v71_v38, %v87_v46  ;;  %v92_v49 = vsel %vm80_vm4, %v74_v39, %v91_v47  ;;  %v85_v50 = vsel %vm79_vm3, %v82_v41, %v84_v45 }
  0x32   :  { %v89_v51 = vsel %vm79_vm3, %v86_v43, %v88_v48  ;;  %v93_v52 = vsel %vm79_vm3, %v90_v44, %v92_v49  ;;  %v101_v57 = vmul.u32 %v94_v35, %v85_v50 }
  0x33   :  { %v288_v53 = vmul.u32.u64.low %v94_v35, %v93_v52  ;;  %v289_v54 = vmul.u32.u64.high %v94_v35, %v93_v52, %v288_v53  ;;  %v291_v55 = vmul.u32.u64.low %v94_v35, %v89_v51  ;;  %v292_v56 = vmul.u32.u64.high %v94_v35, %v89_v51, %v291_v55 }
  0x35   :  { %vm103_vm5 = vc.u32 %v289_v54, %v291_v55  ;;  %v104_v58 = vadd.s32 1, %v292_v56  ;;  %v102_v7 = vadd.s32 %v291_v55, %v289_v54 }
  0x37   :  { %v105_v59 = vsel %vm103_vm5, %v104_v58, %v292_v56 }
  0x38   :  { %v106_v60 = vadd.s32 %v105_v59, %v101_v57 }
  0x3a   :  { %v107_v61 = vadd.s32 536870912, %v106_v60 }
  0x3c   :  { %v108_v62 = vshrl.u32 %v107_v61, 30 }
  0x3e   :  { %v109_v63 = vshll.u32 %v108_v62, 30  ;;  %v132_v20 = vsub.s32 4, %v108_v62 }
  0x40   :  { %v110_v0 = vsub.s32 %v106_v60, %v109_v63  ;;  %v133_v23 = vsel %vm48_vm7, %v132_v20, %v108_v62 }
  0x41   :  { %v135_v26 = vsel %vm47_vm8, 0, %v133_v23 }
  0x42   :  { %v112_v2 = vsub.s32 0, %v110_v0  ;;  %v139_v27 = vadd.s32 3, %v135_v26 }
  0x44   :  { %v174_v3 = vmin.u32 %v112_v2, %v110_v0  ;;  %v140_v28 = vand.u32 3, %v139_v27 }
  0x46   :  { %v114_v4 = vclz %v174_v3  ;;  %vm145_vm9 = vcmp.eq.s32.totalorder %v140_v28, 2  ;;  %vm142_vm10 = vcmp.eq.s32.totalorder %v140_v28, 0  ;;  %vm141_vm11 = vcmp.lt.s32.totalorder %v140_v28, 2 }
  0x48   :  { %v175_v5 = vadd.s32 4294967294, %v114_v4 }
  0x4a   :  { %vm176_vm6 = vcmp.lt.s32.totalorder %v175_v5, 0 }
  0x4b   :  { %v117_v8 = vsel %vm176_vm6, 0, %v175_v5 }
  0x4c   :  { %v118_v10 = vsub.s32 32, %v117_v8  ;;  %v119_v11 = vshll.u32 %v110_v0, %v117_v8  ;;  %v122_v12 = vsub.s32 4294967266, %v117_v8 }
  0x4e   :  { %v120_v13 = vshrl.u32 %v102_v7, %v118_v10  ;;  %v123_v14 = vadd.s32 127, %v122_v12 }
  0x50   :  { %v121_v15 = vor.u32 %v120_v13, %v119_v11  ;;  %v124_v16 = vshll.u32 %v123_v14, 23 }
  0x52   :  { %v125_v17 = vor.u32 4788187, %v124_v16  ;;  %v128_v18 = vcvt.s32.f32 %v121_v15 }
  0x54   :  { %v126_v19 = vand.u32 2147483647, %v125_v17 }
  0x56   :  { %v129_v21 = vmul.f32 %v128_v18, %v126_v19 }
  0x58   :  { %v130_v22 = vxor.u32 2147483648, %v129_v21 }
  0x5a   :  { %v131_v24 = vsel %vm48_vm7, %v130_v22, %v129_v21 }
  0x5b   :  { %v134_v25 = vsel %vm47_vm8, %v282_v6, %v131_v24 }
  0x5c   :  { %189 = vcosq.f32 %v134_v25 }
  0x5d   :  { %191 = vsinq.f32 %v134_v25 }
  0x66   :  { %v190_v29 = vpop.eup %189 }
  0x67   :  { %v192_v30 = vpop.eup %191  ;;  %v146_v31 = vxor.u32 2147483648, %v190_v29 }
  0x68   :  { %v143_v32 = vxor.u32 2147483648, %v192_v30 }
  0x69   :  { %v147_v9 = vsel %vm145_vm9, %v146_v31, %v192_v30 }
  0x6a   :  { %v144_v33 = vsel %vm142_vm10, %v190_v29, %v143_v32 }
  0x6b   :  { %v148_v34 = vsel %vm141_vm11, %v144_v33, %v147_v9 }
  0x6c   :  { %v149_v35 = vsel %vm138_vm12, nan, %v148_v34 }
  0x6d   :  { %v153_v36 = vsel %vm150_vm13, 0.0, %v149_v35 }
  0x6e   :  { %155 = vst.msk [vmem:[#allocation5] sm:$0xff] %vm154_vm14, %v153_v36 }
  0x6f   :  { %226 = shalt.err (!%p223_p12)
}
  0x70   :  { %s227_s27 = scalar_lea.hbm %s318_s2, 128 }
  0x71   :  { %p228_p13 = scmp.ne.s32.totalorder %s318_s2, %s227_s27  ;;  %p231_p0 = scmp.lt.u32.totalorder %s227_s27, %s318_s2 }
  0x73   :  { %p233_p1 = pnand %p231_p0, %p228_p13 }
  0x75   :  { %236 = shalt.err (!%p233_p1)
}
  0x76   :  { %165 = dma.vmem_to_hbm [thread:$0]  %s163_s1, 128, %s318_s2, [#allocation4]  }
  0x77   :  { %239 = dma.done.wait [#allocation4], 128  }
  0x78   :  { %240 = vsyncadd [#allocation4], 4294967168 }
  0x79   :  { %169 = vsyncpa [#allocation3], 1 }
  0x7a   :  { %170 = vsyncpa [#allocation4], 1 }

</bundles_post_ra>
